<compile_context>
chip_gen: v6e
topology: v6e:2x2x1
jax: 0.10.0
libtpu: 0.0.40
codegen_flags: <defaults>
</compile_context>

<pallas_src>
import math

import jax
import jax.numpy as jnp
from jax.experimental import pallas as pl
from jax.experimental.pallas import tpu as pltpu

# ----- synthetic config (mirrors CommNet.__init__) -----
OBS_SHAPE = (4, 4)
OBS_SIZE = math.prod(OBS_SHAPE)                      # observation_size = 16
MESSAGE_SIZE = 2
N_AGENTS = 3
RECV_MSG_SIZE = MESSAGE_SIZE * (N_AGENTS - 1)        # 4
N_MESSAGES = 2 ** MESSAGE_SIZE                       # 4
N_ACTIONS = 5
HIDDEN = 32
N_RNN_LAYERS = 2
INPUT_SIZE = OBS_SIZE + RECV_MSG_SIZE                # 20
OUTPUT_SIZE = N_ACTIONS + N_MESSAGES                 # 9

# ----- packed parameter-slab layout (one 128-lane-aligned segment per block) -----
SEG = 128
ROWS = ((max(INPUT_SIZE, HIDDEN) + 7) // 8) * 8      # sublane-padded contraction dim
assert ROWS == HIDDEN, "kernel assumes padded input dim == hidden size"
assert 3 * HIDDEN <= SEG, "stacked GRU gates must fit one 128-lane segment"
assert OUTPUT_SIZE <= SEG

MLP_OFF = 0
def _ih_off(l): return SEG * (1 + 2 * l)
def _hh_off(l): return SEG * (2 + 2 * l)
OUT_OFF = SEG * (1 + 2 * N_RNN_LAYERS)
W_COLS = SEG * (2 + 2 * N_RNN_LAYERS)                # 768 for L=2


def commnet_kernel(z_ref, h0_ref, w_ref, b_ref, q_ref, hout_ref):
    # ---- input MLP: Linear + ReLU ----
    x = jnp.dot(z_ref[...], w_ref[:, MLP_OFF:MLP_OFF + HIDDEN],
                preferred_element_type=jnp.float32)
    x = jnp.maximum(x + b_ref[:, MLP_OFF:MLP_OFF + HIDDEN], 0.0)        # (B, H)

    # ---- GRU (seq_len=1); layers statically unrolled; 2 fused dots per layer ----
    for l in range(N_RNN_LAYERS):
        ih, hh = _ih_off(l), _hh_off(l)
        h_prev = h0_ref[l]                                              # (B, H)
        gi = jnp.dot(x, w_ref[:, ih:ih + 3 * HIDDEN],
                     preferred_element_type=jnp.float32) + b_ref[:, ih:ih + 3 * HIDDEN]
        gh = jnp.dot(h_prev, w_ref[:, hh:hh + 3 * HIDDEN],
                     preferred_element_type=jnp.float32) + b_ref[:, hh:hh + 3 * HIDDEN]
        r  = jax.nn.sigmoid(gi[:, 0:HIDDEN]          + gh[:, 0:HIDDEN])
        zg = jax.nn.sigmoid(gi[:, HIDDEN:2 * HIDDEN] + gh[:, HIDDEN:2 * HIDDEN])
        n  = jnp.tanh(gi[:, 2 * HIDDEN:3 * HIDDEN] + r * gh[:, 2 * HIDDEN:3 * HIDDEN])
        h_new = n + zg * (h_prev - n)                                   # == (1-z)*n + z*h
        hout_ref[l] = h_new
        x = h_new

    # ---- output linear: full 128-wide zero-padded segment -> unmasked store ----
    q_ref[...] = (jnp.dot(x, w_ref[:, OUT_OFF:OUT_OFF + SEG],
                          preferred_element_type=jnp.float32)
                  + b_ref[:, OUT_OFF:OUT_OFF + SEG])


def init_params(key):
    ks = jax.random.split(key, 8)

    def u(k, shape, fan_in):
        bound = 1.0 / math.sqrt(fan_in)
        return jax.random.uniform(k, shape, jnp.float32, -bound, bound)

    # GRU gate order (r, z, n) is pre-stacked along the output axis, matching
    # torch.nn.GRU's weight_ih_l{k}/weight_hh_l{k} chunk order; weights are
    # stored (in, out) so y = x @ W + b.
    return {
        "mlp_w": u(ks[0], (INPUT_SIZE, HIDDEN), INPUT_SIZE),
        "mlp_b": u(ks[1], (HIDDEN,), INPUT_SIZE),
        "w_ih": u(ks[2], (N_RNN_LAYERS, HIDDEN, 3 * HIDDEN), HIDDEN),
        "w_hh": u(ks[3], (N_RNN_LAYERS, HIDDEN, 3 * HIDDEN), HIDDEN),
        "b_ih": u(ks[4], (N_RNN_LAYERS, 3 * HIDDEN), HIDDEN),
        "b_hh": u(ks[5], (N_RNN_LAYERS, 3 * HIDDEN), HIDDEN),
        "out_w": u(ks[6], (HIDDEN, OUTPUT_SIZE), HIDDEN),
        "out_b": u(ks[7], (OUTPUT_SIZE,), HIDDEN),
    }


def pack_params(p):
    """Pack every weight/bias into one lane-dense slab each (built once)."""
    w = jnp.zeros((ROWS, W_COLS), jnp.float32)
    b = jnp.zeros((1, W_COLS), jnp.float32)
    w = w.at[:INPUT_SIZE, MLP_OFF:MLP_OFF + HIDDEN].set(p["mlp_w"])
    b = b.at[0, MLP_OFF:MLP_OFF + HIDDEN].set(p["mlp_b"])
    for l in range(N_RNN_LAYERS):
        ih, hh = _ih_off(l), _hh_off(l)
        w = w.at[:HIDDEN, ih:ih + 3 * HIDDEN].set(p["w_ih"][l])
        w = w.at[:HIDDEN, hh:hh + 3 * HIDDEN].set(p["w_hh"][l])
        b = b.at[0, ih:ih + 3 * HIDDEN].set(p["b_ih"][l])
        b = b.at[0, hh:hh + 3 * HIDDEN].set(p["b_hh"][l])
    w = w.at[:HIDDEN, OUT_OFF:OUT_OFF + OUTPUT_SIZE].set(p["out_w"])
    b = b.at[0, OUT_OFF:OUT_OFF + OUTPUT_SIZE].set(p["out_b"])
    return w, b


@jax.jit
def commnet_forward(observation, message, hidden, w_slab, b_slab):
    """Batched CommNet forward (each batch row is an independent agent).

    observation: (B, *OBS_SHAPE), message: (B, RECV_MSG_SIZE),
    hidden: (L, B, HIDDEN)  (torch GRU hidden layout, batch = agents).
    Returns Q_u (B, N_ACTIONS), Q_m (B, N_MESSAGES), hidden_out (L, B, HIDDEN).
    """
    B = observation.shape[0]
    b_pad = ((B + 7) // 8) * 8                       # fill the 8 sublanes

    obs_flat = observation.reshape(B, -1).astype(jnp.float32)
    z = jnp.concatenate([obs_flat, message.astype(jnp.float32)], axis=1)  # (B, INPUT_SIZE)
    z_pad = jnp.zeros((b_pad, ROWS), jnp.float32).at[:B, :INPUT_SIZE].set(z)
    h_pad = jnp.zeros((N_RNN_LAYERS, b_pad, HIDDEN), jnp.float32).at[:, :B].set(
        hidden.astype(jnp.float32))

    q, h_out = pl.pallas_call(
        commnet_kernel,
        out_shape=(
            jax.ShapeDtypeStruct((b_pad, SEG), jnp.float32),              # lane-dense Q slab
            jax.ShapeDtypeStruct((N_RNN_LAYERS, b_pad, HIDDEN), jnp.float32),
        ),
        in_specs=[pl.BlockSpec(memory_space=pltpu.MemorySpace.VMEM)] * 4,
        out_specs=(
            pl.BlockSpec(memory_space=pltpu.MemorySpace.VMEM),
            pl.BlockSpec(memory_space=pltpu.MemorySpace.VMEM),
        ),
        # hidden state updated in place: no extra HBM round-trip in a rollout loop
        input_output_aliases={1: 1},
    )(z_pad, h_pad, w_slab, b_slab)

    Q_u = q[:B, :N_ACTIONS]
    Q_m = q[:B, N_ACTIONS:OUTPUT_SIZE]
    hidden_out = h_out[:, :B, :]
    return Q_u, Q_m, hidden_out


def commnet_reference(observation, message, hidden, p):
    """Pure-JAX reference (same math as torch CommNet with enable_rnn/messaging)."""
    hp = jax.lax.Precision.HIGHEST
    B = observation.shape[0]
    z = jnp.concatenate([observation.reshape(B, -1), message], axis=1)
    x = jax.nn.relu(jnp.dot(z, p["mlp_w"], precision=hp) + p["mlp_b"])
    hs = []
    for l in range(N_RNN_LAYERS):
        h_prev = hidden[l]
        gi = jnp.dot(x, p["w_ih"][l], precision=hp) + p["b_ih"][l]
        gh = jnp.dot(h_prev, p["w_hh"][l], precision=hp) + p["b_hh"][l]
        r = jax.nn.sigmoid(gi[:, :HIDDEN] + gh[:, :HIDDEN])
        zg = jax.nn.sigmoid(gi[:, HIDDEN:2 * HIDDEN] + gh[:, HIDDEN:2 * HIDDEN])
        n = jnp.tanh(gi[:, 2 * HIDDEN:] + r * gh[:, 2 * HIDDEN:])
        h_new = (1.0 - zg) * n + zg * h_prev
        hs.append(h_new)
        x = h_new
    q = jnp.dot(x, p["out_w"], precision=hp) + p["out_b"]
    return q[:, :N_ACTIONS], q[:, N_ACTIONS:], jnp.stack(hs)


if __name__ == "__main__":
    key = jax.random.PRNGKey(0)
    k_p, k_obs, k_msg, k_h = jax.random.split(key, 4)

    params = init_params(k_p)
    w_slab, b_slab = pack_params(params)

    observation = jax.random.normal(k_obs, (N_AGENTS,) + OBS_SHAPE, jnp.float32)
    message = jax.random.bernoulli(
        k_msg, 0.5, (N_AGENTS, RECV_MSG_SIZE)).astype(jnp.float32)
    hidden = 0.1 * jax.random.normal(
        k_h, (N_RNN_LAYERS, N_AGENTS, HIDDEN), jnp.float32)

    Q_u, Q_m, hidden_out = commnet_forward(observation, message, hidden, w_slab, b_slab)
    jax.block_until_ready((Q_u, Q_m, hidden_out))

    assert Q_u.shape == (N_AGENTS, N_ACTIONS)
    assert Q_m.shape == (N_AGENTS, N_MESSAGES)
    assert hidden_out.shape == (N_RNN_LAYERS, N_AGENTS, HIDDEN)

    # sanity check against the pure-JAX reference
    r_Qu, r_Qm, r_h = commnet_reference(observation, message, hidden, params)
    assert jnp.allclose(Q_u, r_Qu, atol=2e-2, rtol=2e-2)
    assert jnp.allclose(Q_m, r_Qm, atol=2e-2, rtol=2e-2)
    assert jnp.allclose(hidden_out, r_h, atol=2e-2, rtol=2e-2)

    print("KERNEL_OK")
</pallas_src>

<mosaic_0001>
module attributes {stable_mosaic.version = 11 : i64} {
  func.func @commnet_kernel(%arg0: memref<8x32xf32, #tpu.memory_space<vmem>>, %arg1: memref<2x8x32xf32, #tpu.memory_space<vmem>>, %arg2: memref<32x768xf32, #tpu.memory_space<vmem>>, %arg3: memref<1x768xf32, #tpu.memory_space<vmem>>, %arg4: memref<8x128xf32, #tpu.memory_space<vmem>>, %arg5: memref<2x8x32xf32, #tpu.memory_space<vmem>>) attributes {dimension_semantics = [], scalar_prefetch = 0 : i64, scratch_operands = 0 : i64, tpu.core_type = #tpu.core_type<tc>} {
    %c0 = arith.constant 0 : index
    %c0_0 = arith.constant 0 : index
    %0 = vector.load %arg0[%c0, %c0_0] : memref<8x32xf32, #tpu.memory_space<vmem>>, vector<8x32xf32>
    %c0_1 = arith.constant 0 : index
    %c0_2 = arith.constant 0 : index
    %1 = vector.load %arg2[%c0_1, %c0_2] : memref<32x768xf32, #tpu.memory_space<vmem>>, vector<32x32xf32>
    %cst = arith.constant dense<0.000000e+00> : vector<8x32xf32>
    %2 = tpu.matmul %0, %1, %cst {dimension_numbers = #tpu.dot_dimension_numbers<[1], [0], [0], [1], [0, 0, 1, 1], [], []>} : vector<8x32xf32>, vector<32x32xf32>, vector<8x32xf32> -> vector<8x32xf32>
    %c0_3 = arith.constant 0 : index
    %c0_4 = arith.constant 0 : index
    %3 = vector.load %arg3[%c0_3, %c0_4] : memref<1x768xf32, #tpu.memory_space<vmem>>, vector<1x32xf32>
    %4 = vector.broadcast %3 : vector<1x32xf32> to vector<8x32xf32>
    %5 = arith.addf %2, %4 : vector<8x32xf32>
    %cst_5 = arith.constant 0.000000e+00 : f32
    %6 = vector.broadcast %cst_5 : f32 to vector<8x32xf32>
    %7 = arith.maximumf %5, %6 : vector<8x32xf32>
    %c0_6 = arith.constant 0 : index
    %c0_7 = arith.constant 0 : index
    %c0_8 = arith.constant 0 : index
    %8 = vector.load %arg1[%c0_6, %c0_7, %c0_8] : memref<2x8x32xf32, #tpu.memory_space<vmem>>, vector<1x8x32xf32>
    %9 = vector.shape_cast %8 : vector<1x8x32xf32> to vector<8x32xf32>
    %c0_9 = arith.constant 0 : index
    %c128 = arith.constant 128 : index
    %10 = vector.load %arg2[%c0_9, %c128] : memref<32x768xf32, #tpu.memory_space<vmem>>, vector<32x96xf32>
    %cst_10 = arith.constant dense<0.000000e+00> : vector<8x96xf32>
    %11 = tpu.matmul %7, %10, %cst_10 {dimension_numbers = #tpu.dot_dimension_numbers<[1], [0], [0], [1], [0, 0, 1, 1], [], []>} : vector<8x32xf32>, vector<32x96xf32>, vector<8x96xf32> -> vector<8x96xf32>
    %c0_11 = arith.constant 0 : index
    %c128_12 = arith.constant 128 : index
    %12 = vector.load %arg3[%c0_11, %c128_12] : memref<1x768xf32, #tpu.memory_space<vmem>>, vector<1x96xf32>
    %13 = vector.broadcast %12 : vector<1x96xf32> to vector<8x96xf32>
    %14 = arith.addf %11, %13 : vector<8x96xf32>
    %c0_13 = arith.constant 0 : index
    %c256 = arith.constant 256 : index
    %15 = vector.load %arg2[%c0_13, %c256] : memref<32x768xf32, #tpu.memory_space<vmem>>, vector<32x96xf32>
    %cst_14 = arith.constant dense<0.000000e+00> : vector<8x96xf32>
    %16 = tpu.matmul %9, %15, %cst_14 {dimension_numbers = #tpu.dot_dimension_numbers<[1], [0], [0], [1], [0, 0, 1, 1], [], []>} : vector<8x32xf32>, vector<32x96xf32>, vector<8x96xf32> -> vector<8x96xf32>
    %c0_15 = arith.constant 0 : index
    %c256_16 = arith.constant 256 : index
    %17 = vector.load %arg3[%c0_15, %c256_16] : memref<1x768xf32, #tpu.memory_space<vmem>>, vector<1x96xf32>
    %18 = vector.broadcast %17 : vector<1x96xf32> to vector<8x96xf32>
    %19 = arith.addf %16, %18 : vector<8x96xf32>
    %20 = vector.extract_strided_slice %14 {offsets = [0, 0], sizes = [8, 32], strides = [1, 1]} : vector<8x96xf32> to vector<8x32xf32>
    %21 = vector.extract_strided_slice %19 {offsets = [0, 0], sizes = [8, 32], strides = [1, 1]} : vector<8x96xf32> to vector<8x32xf32>
    %22 = arith.addf %20, %21 : vector<8x32xf32>
    %23 = arith.negf %22 : vector<8x32xf32>
    %24 = math.exp %23 : vector<8x32xf32>
    %cst_17 = arith.constant 1.000000e+00 : f32
    %25 = vector.broadcast %cst_17 : f32 to vector<8x32xf32>
    %26 = arith.addf %25, %24 : vector<8x32xf32>
    %27 = arith.divf %25, %26 : vector<8x32xf32>
    %28 = vector.extract_strided_slice %14 {offsets = [0, 32], sizes = [8, 32], strides = [1, 1]} : vector<8x96xf32> to vector<8x32xf32>
    %29 = vector.extract_strided_slice %19 {offsets = [0, 32], sizes = [8, 32], strides = [1, 1]} : vector<8x96xf32> to vector<8x32xf32>
    %30 = arith.addf %28, %29 : vector<8x32xf32>
    %31 = arith.negf %30 : vector<8x32xf32>
    %32 = math.exp %31 : vector<8x32xf32>
    %cst_18 = arith.constant 1.000000e+00 : f32
    %33 = vector.broadcast %cst_18 : f32 to vector<8x32xf32>
    %34 = arith.addf %33, %32 : vector<8x32xf32>
    %35 = arith.divf %33, %34 : vector<8x32xf32>
    %36 = vector.extract_strided_slice %14 {offsets = [0, 64], sizes = [8, 32], strides = [1, 1]} : vector<8x96xf32> to vector<8x32xf32>
    %37 = vector.extract_strided_slice %19 {offsets = [0, 64], sizes = [8, 32], strides = [1, 1]} : vector<8x96xf32> to vector<8x32xf32>
    %38 = arith.mulf %27, %37 : vector<8x32xf32>
    %39 = arith.addf %36, %38 : vector<8x32xf32>
    %40 = math.tanh %39 : vector<8x32xf32>
    %41 = arith.subf %9, %40 : vector<8x32xf32>
    %42 = arith.mulf %35, %41 : vector<8x32xf32>
    %43 = arith.addf %40, %42 : vector<8x32xf32>
    %c0_19 = arith.constant 0 : index
    %c0_20 = arith.constant 0 : index
    %c0_21 = arith.constant 0 : index
    %44 = vector.load %arg5[%c0_19, %c0_20, %c0_21] : memref<2x8x32xf32, #tpu.memory_space<vmem>>, vector<1x8x32xf32>
    %45 = vector.shape_cast %44 : vector<1x8x32xf32> to vector<8x32xf32>
    %46 = vector.shape_cast %43 : vector<8x32xf32> to vector<1x8x32xf32>
    tpu.vector_store %arg5[%c0_19, %c0_20, %c0_21], %46 {strides = array<i32>} : memref<2x8x32xf32, #tpu.memory_space<vmem>>, vector<1x8x32xf32>,
    %c1 = arith.constant 1 : index
    %c0_22 = arith.constant 0 : index
    %c0_23 = arith.constant 0 : index
    %47 = vector.load %arg1[%c1, %c0_22, %c0_23] : memref<2x8x32xf32, #tpu.memory_space<vmem>>, vector<1x8x32xf32>
    %48 = vector.shape_cast %47 : vector<1x8x32xf32> to vector<8x32xf32>
    %c0_24 = arith.constant 0 : index
    %c384 = arith.constant 384 : index
    %49 = vector.load %arg2[%c0_24, %c384] : memref<32x768xf32, #tpu.memory_space<vmem>>, vector<32x96xf32>
    %cst_25 = arith.constant dense<0.000000e+00> : vector<8x96xf32>
    %50 = tpu.matmul %43, %49, %cst_25 {dimension_numbers = #tpu.dot_dimension_numbers<[1], [0], [0], [1], [0, 0, 1, 1], [], []>} : vector<8x32xf32>, vector<32x96xf32>, vector<8x96xf32> -> vector<8x96xf32>
    %c0_26 = arith.constant 0 : index
    %c384_27 = arith.constant 384 : index
    %51 = vector.load %arg3[%c0_26, %c384_27] : memref<1x768xf32, #tpu.memory_space<vmem>>, vector<1x96xf32>
    %52 = vector.broadcast %51 : vector<1x96xf32> to vector<8x96xf32>
    %53 = arith.addf %50, %52 : vector<8x96xf32>
    %c0_28 = arith.constant 0 : index
    %c512 = arith.constant 512 : index
    %54 = vector.load %arg2[%c0_28, %c512] : memref<32x768xf32, #tpu.memory_space<vmem>>, vector<32x96xf32>
    %cst_29 = arith.constant dense<0.000000e+00> : vector<8x96xf32>
    %55 = tpu.matmul %48, %54, %cst_29 {dimension_numbers = #tpu.dot_dimension_numbers<[1], [0], [0], [1], [0, 0, 1, 1], [], []>} : vector<8x32xf32>, vector<32x96xf32>, vector<8x96xf32> -> vector<8x96xf32>
    %c0_30 = arith.constant 0 : index
    %c512_31 = arith.constant 512 : index
    %56 = vector.load %arg3[%c0_30, %c512_31] : memref<1x768xf32, #tpu.memory_space<vmem>>, vector<1x96xf32>
    %57 = vector.broadcast %56 : vector<1x96xf32> to vector<8x96xf32>
    %58 = arith.addf %55, %57 : vector<8x96xf32>
    %59 = vector.extract_strided_slice %53 {offsets = [0, 0], sizes = [8, 32], strides = [1, 1]} : vector<8x96xf32> to vector<8x32xf32>
    %60 = vector.extract_strided_slice %58 {offsets = [0, 0], sizes = [8, 32], strides = [1, 1]} : vector<8x96xf32> to vector<8x32xf32>
    %61 = arith.addf %59, %60 : vector<8x32xf32>
    %62 = arith.negf %61 : vector<8x32xf32>
    %63 = math.exp %62 : vector<8x32xf32>
    %cst_32 = arith.constant 1.000000e+00 : f32
    %64 = vector.broadcast %cst_32 : f32 to vector<8x32xf32>
    %65 = arith.addf %64, %63 : vector<8x32xf32>
    %66 = arith.divf %64, %65 : vector<8x32xf32>
    %67 = vector.extract_strided_slice %53 {offsets = [0, 32], sizes = [8, 32], strides = [1, 1]} : vector<8x96xf32> to vector<8x32xf32>
    %68 = vector.extract_strided_slice %58 {offsets = [0, 32], sizes = [8, 32], strides = [1, 1]} : vector<8x96xf32> to vector<8x32xf32>
    %69 = arith.addf %67, %68 : vector<8x32xf32>
    %70 = arith.negf %69 : vector<8x32xf32>
    %71 = math.exp %70 : vector<8x32xf32>
    %cst_33 = arith.constant 1.000000e+00 : f32
    %72 = vector.broadcast %cst_33 : f32 to vector<8x32xf32>
    %73 = arith.addf %72, %71 : vector<8x32xf32>
    %74 = arith.divf %72, %73 : vector<8x32xf32>
    %75 = vector.extract_strided_slice %53 {offsets = [0, 64], sizes = [8, 32], strides = [1, 1]} : vector<8x96xf32> to vector<8x32xf32>
    %76 = vector.extract_strided_slice %58 {offsets = [0, 64], sizes = [8, 32], strides = [1, 1]} : vector<8x96xf32> to vector<8x32xf32>
    %77 = arith.mulf %66, %76 : vector<8x32xf32>
    %78 = arith.addf %75, %77 : vector<8x32xf32>
    %79 = math.tanh %78 : vector<8x32xf32>
    %80 = arith.subf %48, %79 : vector<8x32xf32>
    %81 = arith.mulf %74, %80 : vector<8x32xf32>
    %82 = arith.addf %79, %81 : vector<8x32xf32>
    %c1_34 = arith.constant 1 : index
    %c0_35 = arith.constant 0 : index
    %c0_36 = arith.constant 0 : index
    %83 = vector.load %arg5[%c1_34, %c0_35, %c0_36] : memref<2x8x32xf32, #tpu.memory_space<vmem>>, vector<1x8x32xf32>
    %84 = vector.shape_cast %83 : vector<1x8x32xf32> to vector<8x32xf32>
    %85 = vector.shape_cast %82 : vector<8x32xf32> to vector<1x8x32xf32>
    tpu.vector_store %arg5[%c1_34, %c0_35, %c0_36], %85 {strides = array<i32>} : memref<2x8x32xf32, #tpu.memory_space<vmem>>, vector<1x8x32xf32>,
    %c0_37 = arith.constant 0 : index
    %c640 = arith.constant 640 : index
    %86 = vector.load %arg2[%c0_37, %c640] : memref<32x768xf32, #tpu.memory_space<vmem>>, vector<32x128xf32>
    %cst_38 = arith.constant dense<0.000000e+00> : vector<8x128xf32>
    %87 = tpu.matmul %82, %86, %cst_38 {dimension_numbers = #tpu.dot_dimension_numbers<[1], [0], [0], [1], [0, 0, 1, 1], [], []>} : vector<8x32xf32>, vector<32x128xf32>, vector<8x128xf32> -> vector<8x128xf32>
    %c0_39 = arith.constant 0 : index
    %c640_40 = arith.constant 640 : index
    %88 = vector.load %arg3[%c0_39, %c640_40] : memref<1x768xf32, #tpu.memory_space<vmem>>, vector<1x128xf32>
    %89 = vector.broadcast %88 : vector<1x128xf32> to vector<8x128xf32>
    %90 = arith.addf %87, %89 : vector<8x128xf32>
    %c0_41 = arith.constant 0 : index
    %c0_42 = arith.constant 0 : index
    %91 = vector.load %arg4[%c0_41, %c0_42] : memref<8x128xf32, #tpu.memory_space<vmem>>, vector<8x128xf32>
    tpu.vector_store %arg4[%c0_41, %c0_42], %90 {strides = array<i32>} : memref<8x128xf32, #tpu.memory_space<vmem>>, vector<8x128xf32>,
    return
  }
}

</mosaic_0001>

<bundles_post_ra>
// kernel: commnet_forward.1
= control target key start
LH: loop header
LB: loop body
LE: loop exit
PB: predicated region body
PF: predicated region fallthrough
CT: control target
= control target key end

     0   :  { %11 = vsyncpa [#allocation3], 0  ;;  %s781_s18 = smov [#allocation2]   ;;  %s913_s0 = inlined_call_operand.vmem [shape: f32[8,32], index: 0, kind: input, shape index: {}]   ;;  %s914_s1 = inlined_call_operand.vmem [shape: f32[2,8,32], index: 1, kind: input, shape index: {}, may-alias: {1,5}]   ;;  %s915_s2 = inlined_call_operand.hbm [shape: f32[32,768], index: 2, kind: input, shape index: {}]   ;;  %s916_s3 = inlined_call_operand.vmem [shape: f32[1,768], index: 3, kind: input, shape index: {}]   ;;  %s917_s4 = inlined_call_operand.vmem [shape: f32[8,128], index: 4, kind: output, shape index: {0}]   ;;  %s918_s5 = inlined_call_operand.vmem [shape: f32[2,8,32], index: 5, kind: output, shape index: {1}, may-alias: {1,5}]  }
   0x1   :  { %s21_s19 = sshll.u32 %s781_s18, 4  ;;  %s22_s19 = int_to_ptr.vmem [resolvable:$true] %s21_s19 }
   0x2   :  { %s767_s20 = scalar_lea.vmem %s22_s19, 3072  ;;  %p772_p1 = scmp.lt.s32.totalorder %s22_s19, %s22_s19 }
   0x3   :  { %p768_p0 = scmp.ne.s32.totalorder %s22_s19, %s767_s20  ;;  %p773_p2 = scmp.lt.s32.totalorder %s767_s20, %s767_s20 }
   0x5   :  { %p774_p3 = por %p773_p2, %p772_p1 }
   0x7   :  { %p775_p4 = pnand %p774_p3, %p768_p0 }
   0x9   :  { %778 = shalt.err (!%p775_p4)
}
   0xa   :  { %s782_s21 = smov 768   ;;  %s783_s22 = smov 48  }
   0xb   :  { %27 = dma.hbm_to_vmem [thread:$0]  %s915_s2, 3072, %s22_s19, [#allocation3], %s782_s21, %s782_s21, %s783_s22  }
   0xc   :  { %779 = dma.done.wait [#allocation3], 3072  }
   0xd   :  { %780 = vsyncadd [#allocation3], 4294964224  ;;  %v784_v0 = vmov 0.0   ;;  %vm785_vm0 = vmmov 0   ;;  %v37_v1 = vld [vmem:[#allocation2 + $0x90] sm:$0xff]  ;;  %v36_v2 = vld [vmem:[#allocation2 + $0x60] sm:$0xff] }
   0xe   :  { %674 = vmatprep.subr.mxu0 %v784_v0  ;;  %682 = vmatprep.mubr.msk.f32.mxu0 %vm785_vm0, %v784_v0  ;;  %v35_v3 = vld [vmem:[#allocation2 + $0x30] sm:$0xff]  ;;  %v124_v4 = vld [vmem:[#allocation2 + $0x98] sm:$0xff]  ;;  %v34_v5 = vld [vmem:[#allocation2] sm:$0xff]  ;;  %vm45_vm1 = vcmask 261120   ;;  %s786_s6 = smov 64   ;;  %s787_s9 = smov 32  }
   0xf   :  { %685 = vmatprep.subr.mxu1 %v784_v0  ;;  %693 = vmatprep.mubr.msk.f32.mxu1 %vm785_vm0, %v784_v0  ;;  %v33_v6 = vld [vmem:[%s913_s0] sm:$0xff]  ;;  %v207_v8 = vld [vmem:[#allocation2 + $0x70] sm:$0xff]  ;;  %v123_v12 = vld [vmem:[#allocation2 + $0x68] sm:$0xff] }
  0x10   :  { %675 = vmatpush3.msra.mxu0 %v37_v1  ;;  %686 = vmatpush3.msra.mxu1 %v124_v4  ;;  %v208_v7 = vld [vmem:[#allocation2 + $0xa0] sm:$0xff]  ;;  %v205_v10 = vld [vmem:[#allocation2 + $0x10] sm:$0xff]  ;;  %v122_v13 = vld [vmem:[#allocation2 + $0x38] sm:$0xff] }
  0x11   :  { %676 = vmatprep.subr.mxu0 %v784_v0  ;;  %687 = vmatprep.subr.mxu1 %v784_v0  ;;  %v206_v9 = vld [vmem:[#allocation2 + $0x40] sm:$0xff]  ;;  %v121_v14 = vld [vmem:[#allocation2 + $0x8] sm:$0xff]  ;;  %v415_v40 = vld [vmem:[#allocation2 + $0xb0] sm:$0xff] }
  0x12   :  { %677 = vmatpush3.msra.mxu0 %v36_v2  ;;  %v120_v11 = vld [vmem:[%s914_s1] sm:$0xff]  ;;  %688 = vmatpush3.msra.mxu1 %v123_v12  ;;  %v332_v42 = vld [vmem:[#allocation2 + $0xa8] sm:$0xff]  ;;  %v413_v43 = vld [vmem:[#allocation2 + $0x50] sm:$0xff] }
  0x13   :  { %678 = vmatprep.subr.mxu0 %v784_v0  ;;  %689 = vmatprep.subr.mxu1 %v784_v0  ;;  %v628_v15 = vld [vmem:[%s916_s3] ss:$0 sm:$0xff]  ;;  %v632_v20 = vld [vmem:[%s916_s3 + $0x2] ss:$0 sm:$0xff]  ;;  %v630_v24 = vld [vmem:[%s916_s3 + $0x1] ss:$0 sm:$0xff] }
  0x14   :  { %679 = vmatpush3.msra.mxu0 %v35_v3  ;;  %690 = vmatpush3.msra.mxu1 %v122_v13  ;;  %v414_v41 = vld [vmem:[#allocation2 + $0x80] sm:$0xff]  ;;  %v331_v44 = vld [vmem:[#allocation2 + $0x78] sm:$0xff]  ;;  %v330_v45 = vld [vmem:[#allocation2 + $0x48] sm:$0xff] }
  0x15   :  { %680 = vmatprep.subr.mxu0 %v784_v0  ;;  %691 = vmatprep.subr.mxu1 %v784_v0  ;;  %v412_v46 = vld [vmem:[#allocation2 + $0x20] sm:$0xff]  ;;  %v635_v47 = vld [vmem:[%s914_s1 + $0x8] sm:$0xff]  ;;  %v329_v48 = vld [vmem:[#allocation2 + $0x18] sm:$0xff] }
  0x16   :  { %681 = vmatpush3.msra.mxu0 %v34_v5  ;;  %692 = vmatpush3.msra.mxu1 %v121_v14  ;;  %v638_v53 = vld [vmem:[%s916_s3 + $0x4] ss:$0 sm:$0xff]  ;;  %v636_v58 = vld [vmem:[%s916_s3 + $0x3] ss:$0 sm:$0xff]  ;;  %v537_v12 = vld [vmem:[#allocation2 + $0x88] sm:$0xff] }
  0x17   :  { %683 = vmatmul.mubr.msk.f32.vlgmr.msra.gmra.mxu0 %vm45_vm1, %v33_v6  ;;  %696 = vmatprep.subr.mxu0 %v784_v0  ;;  %v536_v13 = vld [vmem:[#allocation2 + $0x58] sm:$0xff]  ;;  %v535_v14 = vld [vmem:[#allocation2 + $0x28] sm:$0xff] }
  0x18   :  { %697 = vmatpush3.msra.mxu0 %v208_v7  ;;  %704 = vmatprep.mubr.msk.f32.mxu0 %vm785_vm0, %v784_v0 }
  0x19   :  { %698 = vmatprep.subr.mxu0 %v784_v0  ;;  %707 = vmatprep.subr.mxu1 %v784_v0 }
  0x1a   :  { %699 = vmatpush3.msra.mxu0 %v207_v8 }
  0x1b   :  { %700 = vmatprep.subr.mxu0 %v784_v0 }
  0x1c   :  { %701 = vmatpush3.msra.mxu0 %v206_v9 }
  0x1d   :  { %702 = vmatprep.subr.mxu0 %v784_v0 }
  0x1e   :  { %703 = vmatpush3.msra.mxu0 %v205_v10 }
  0x1f   :  { %705 = vmatmul.mubr.msk.f32.vlgmr.msra.gmra.mxu0 %vm45_vm1, %v120_v11  ;;  %718 = vmatprep.subr.mxu0 %v784_v0 }
  0x20   :  { %726 = vmatprep.mubr.msk.f32.mxu0 %vm785_vm0, %v784_v0  ;;  %719 = vmatpush3.msra.mxu0 %v415_v40 }
  0x21   :  { %720 = vmatprep.subr.mxu0 %v784_v0 }
  0x22   :  { %721 = vmatpush3.msra.mxu0 %v414_v41 }
  0x23   :  { %722 = vmatprep.subr.mxu0 %v784_v0 }
  0x24   :  { %723 = vmatpush3.msra.mxu0 %v413_v43 }
  0x25   :  { %724 = vmatprep.subr.mxu0 %v784_v0 }
  0x26   :  { %725 = vmatpush3.msra.mxu0 %v412_v46 }
  0x27   :  { %727 = vmatmul.mubr.msk.f32.vlgmr.msra.gmra.mxu0 %vm45_vm1, %v635_v47 }
  0xd7   :  { %v115_v16 = vpop.f32.mrf.mxu0 }
  0xd8   :  { %v116_v17 = vadd.f32 %v628_v15, %v115_v16 }
  0xd9   :  { %v684_v18 = vpop.f32.mrf.mxu0 }
  0xda   :  { %v119_v19 = vmax.f32 %v116_v17, 0.0 }
  0xdc   :  { %694 = vmatmul.mubr.msk.f32.vlgmr.msra.gmra.mxu1 %vm45_vm1, %v119_v19 }
  0xdd   :  { %715 = vmatprep.mubr.msk.f32.mxu1 %vm785_vm0, %v784_v0  ;;  %708 = vmatpush3.msra.mxu1 %v332_v42 }
  0xde   :  { %709 = vmatprep.subr.mxu1 %v784_v0 }
  0xdf   :  { %v285_v21 = vpop.f32.mrf.mxu0  ;;  %710 = vmatpush3.msra.mxu1 %v331_v44 }
  0xe0   :  { %v286_v22 = vadd.f32 %v632_v20, %v285_v21  ;;  %711 = vmatprep.subr.mxu1 %v784_v0 }
  0xe1   :  { %v706_v23 = vpop.f32.mrf.mxu0  ;;  %712 = vmatpush3.msra.mxu1 %v330_v45 }
  0xe2   :  { %297 = vrot.lane.b32.xlu0 %v286_v22, %s786_s6  ;;  %713 = vmatprep.subr.mxu1 %v784_v0 }
  0xe3   :  { %714 = vmatpush3.msra.mxu1 %v329_v48 }
  0xe4   :  { %729 = vmatprep.subr.mxu1 %v784_v0 }
  0xe7   :  { %v492_v54 = vpop.f32.mrf.mxu0 }
  0xe8   :  { %v493_v55 = vadd.f32 %v638_v53, %v492_v54 }
  0xe9   :  { %v728_v56 = vpop.f32.mrf.mxu0 }
 0x154   :  { %v298_v32 = vpop.permute.xlu0 %297 }
 0x19c   :  { %v201_v25 = vpop.f32.mrf.mxu1 }
 0x19d   :  { %v202_v26 = vadd.f32 %v630_v24, %v201_v25 }
 0x19e   :  { %v695_v27 = vpop.f32.mrf.mxu1 }
 0x19f   :  { %v289_v28 = vadd.f32 %v286_v22, %v202_v26 }
 0x1a1   :  { %v634_v29 = vmul.f32 -1.442695, %v289_v28 }
 0x1a3   :  { %747 = vpow2.f32 %v634_v29 }
 0x1b0   :  { %v748_v30 = vpop.eup %747 }
 0x1b1   :  { %v293_v31 = vadd.f32 1.0, %v748_v30 }
 0x1b3   :  { %749 = vrcp.f32 %v293_v31 }
 0x1c0   :  { %v750_v33 = vpop.eup %749 }
 0x1c1   :  { %v300_v34 = vmul.f32 %v750_v33, %v298_v32 }
 0x1c3   :  { %302 = vrot.lane.b32.xlu0 %v300_v34, %s786_s6 }
 0x235   :  { %v303_v35 = vpop.permute.xlu0 %302 }
 0x236   :  { %v305_v36 = vadd.f32 %v303_v35, %v202_v26 }
 0x238   :  { %751 = vtanh.f32 %v305_v36 }
 0x245   :  { %v752_v37 = vpop.eup %751 }
 0x246   :  { %308 = vrot.lane.b32.xlu1 %v752_v37, %s786_s6 }
 0x2b8   :  { %v309_v38 = vpop.permute.xlu1 %308 }
 0x2b9   :  { %v311_v39 = vsub.f32 %v120_v11, %v309_v38  ;;  %v538_v11 = vld [vmem:[#allocation2 + $0xb8] sm:$0xff] }
 0x2bb   :  { %313 = vrot.lane.b32.xlu1 %v311_v39, %s787_s9 }
 0x32d   :  { %v314_v49 = vpop.permute.xlu1 %313 }
 0x32e   :  { %v316_v50 = vmul.f32 %v750_v33, %v314_v49 }
 0x330   :  { %318 = vrot.lane.b32.xlu0 %v316_v50, %s787_s9 }
 0x334   :  { %504 = vrot.lane.b32.xlu0 %v493_v55, %s786_s6 }
 0x3a2   :  { %v319_v51 = vpop.permute.xlu0 %318 }
 0x3a3   :  { %v321_v52 = vadd.f32 %v752_v37, %v319_v51 }
 0x3a5   :  { %323 = vrot.lane.b32.xlu1 %v321_v52, %s786_s6 }
 0x3a6   :  { %v505_v3 = vpop.permute.xlu0 %504 }
 0x417   :  { %v324_v57 = vpop.permute.xlu1 %323 }
 0x418   :  { %326 = vst.msk [vmem:[%s918_s5] sm:$0xff] %vm45_vm1, %v324_v57  ;;  %716 = vmatmul.mubr.msk.f32.vlgmr.msra.gmra.mxu1 %vm45_vm1, %v324_v57 }
 0x419   :  { %737 = vmatprep.mubr.msk.f32.mxu1 %vm785_vm0, %v784_v0  ;;  %730 = vmatpush3.msra.mxu1 %v538_v11 }
 0x41a   :  { %731 = vmatprep.subr.mxu1 %v784_v0 }
 0x41b   :  { %732 = vmatpush3.msra.mxu1 %v537_v12 }
 0x41c   :  { %733 = vmatprep.subr.mxu1 %v784_v0 }
 0x41d   :  { %734 = vmatpush3.msra.mxu1 %v536_v13 }
 0x41e   :  { %735 = vmatprep.subr.mxu1 %v784_v0  ;;  %v642_v0 = vld [vmem:[%s916_s3 + $0x5] ss:$0 sm:$0xff] }
 0x41f   :  { %736 = vmatpush3.msra.mxu1 %v535_v14 }
 0x4d8   :  { %v408_v59 = vpop.f32.mrf.mxu1 }
 0x4d9   :  { %v409_v60 = vadd.f32 %v636_v58, %v408_v59 }
 0x4da   :  { %v717_v61 = vpop.f32.mrf.mxu1 }
 0x4db   :  { %v496_v62 = vadd.f32 %v493_v55, %v409_v60 }
 0x4dd   :  { %v640_v63 = vmul.f32 -1.442695, %v496_v62 }
 0x4df   :  { %753 = vpow2.f32 %v640_v63 }
 0x4ec   :  { %v754_v1 = vpop.eup %753 }
 0x4ed   :  { %v500_v2 = vadd.f32 1.0, %v754_v1 }
 0x4ef   :  { %755 = vrcp.f32 %v500_v2 }
 0x4fc   :  { %v756_v4 = vpop.eup %755 }
 0x4fd   :  { %v507_v5 = vmul.f32 %v756_v4, %v505_v3 }
 0x4ff   :  { %509 = vrot.lane.b32.xlu1 %v507_v5, %s786_s6 }
 0x571   :  { %v510_v6 = vpop.permute.xlu1 %509 }
 0x572   :  { %v512_v7 = vadd.f32 %v510_v6, %v409_v60 }
 0x574   :  { %757 = vtanh.f32 %v512_v7 }
 0x581   :  { %v758_v8 = vpop.eup %757 }
 0x582   :  { %515 = vrot.lane.b32.xlu0 %v758_v8, %s786_s6 }
 0x5f4   :  { %v516_v9 = vpop.permute.xlu0 %515 }
 0x5f5   :  { %v518_v10 = vsub.f32 %v635_v47, %v516_v9 }
 0x5f7   :  { %520 = vrot.lane.b32.xlu1 %v518_v10, %s787_s9 }
 0x669   :  { %v521_v15 = vpop.permute.xlu1 %520 }
 0x66a   :  { %v523_v16 = vmul.f32 %v756_v4, %v521_v15 }
 0x66c   :  { %525 = vrot.lane.b32.xlu0 %v523_v16, %s787_s9 }
 0x6de   :  { %v526_v17 = vpop.permute.xlu0 %525 }
 0x6df   :  { %v528_v18 = vadd.f32 %v758_v8, %v526_v17 }
 0x6e1   :  { %530 = vrot.lane.b32.xlu1 %v528_v18, %s786_s6 }
 0x753   :  { %v531_v19 = vpop.permute.xlu1 %530 }
 0x754   :  { %641 = vst.msk [vmem:[%s918_s5 + $0x8] sm:$0xff] %vm45_vm1, %v531_v19  ;;  %738 = vmatmul.mubr.msk.f32.vlgmr.msra.gmra.mxu1 %vm45_vm1, %v531_v19 }
 0x814   :  { %v614_v20 = vpop.f32.mrf.mxu1 }
 0x815   :  { %v615_v21 = vadd.f32 %v642_v0, %v614_v20 }
 0x816   :  { %v739_v22 = vpop.f32.mrf.mxu1 }
 0x817   :  { %618 = vst [vmem:[%s917_s4] sm:$0xff] %v615_v21 }
 0x818   :  { %627 = vsyncpa [#allocation3], 1 }

</bundles_post_ra>
